<compile_context>
chip_gen: v7x
topology: tpu7x:2x2x1
jax: 0.10.0
libtpu: 0.0.40
codegen_flags: <defaults>
</compile_context>

<pallas_src>
import jax
import jax.numpy as jnp
from jax.experimental import pallas as pl
from jax.experimental.pallas import tpu as pltpu


def _expand_linear_kernel(x_ref, w_ref, b_ref, o_ref):
    # x_ref: [1, K, TP]  channel-major pixel-shuffled activation tile
    # w_ref: [N, K]      Linear weight in torch layout (out_features, in_features)
    # b_ref: [N, 1]      bias (f32)
    # o_ref: [1, N, TP]  channel-major output tile (NCHW flattened over H'*W')
    acc = jnp.dot(w_ref[...], x_ref[0], preferred_element_type=jnp.float32)  # [N, TP]
    o_ref[0] = (acc + b_ref[...]).astype(o_ref.dtype)


def _pixel_shuffle_channel_major(x, u):
    """[B, C, H, W] -> [B, C//u^2, (H*u)*(W*u)] channel-major pixel-shuffled rows."""
    B, C, H, W = x.shape
    K = C // (u * u)
    x = x.reshape(B, K, u, u, H, W)
    x = jnp.transpose(x, (0, 1, 4, 2, 5, 3))        # (B, K, H, u, W, u)
    return x.reshape(B, K, H * u * W * u)


def _choose_tile_p(P, target, K, N, bytes_per_elem, vmem_budget=12 * 1024 * 1024):
    """Spatial tile: multiple of 128 lanes, dividing P when possible, VMEM-capped."""
    per_col = 2 * (K + N) * bytes_per_elem          # double-buffered in + out per column
    cap = max(128, (vmem_budget // per_col) // 128 * 128)
    target = min(target, cap)
    if P <= target:
        return P                                    # single full-extent block (always legal)
    tp = max(128, (target // 128) * 128)
    for cand in range(tp, 127, -128):               # prefer a divisor -> no masked tail (v5e)
        if P % cand == 0:
            return cand
    return tp                                       # ragged tail: Pallas clips output writes


def patch_expanding_forward(x, weight, bias, upscaling_factor=2, tile_p=4096):
    """Pallas forward of PatchExpanding.

    x:      [B, C, H, W]
    weight: [out_channels, C // u^2]   (torch nn.Linear.weight layout)
    bias:   [out_channels]
    returns [B, out_channels, H*u, W*u]
    """
    u = upscaling_factor
    B, C, H, W = x.shape
    N, K = weight.shape
    assert K == C // (u * u), "weight in_features must equal C // u^2"
    new_h, new_w = H * u, W * u
    P = new_h * new_w

    rows = _pixel_shuffle_channel_major(x, u)       # [B, K, P], x.dtype (bf16 stays bf16)
    w = weight.astype(x.dtype)                      # bf16 path: bf16 MXU operands
    b = bias.astype(jnp.float32).reshape(N, 1)      # f32 bias add inside the kernel

    itemsize = jnp.dtype(x.dtype).itemsize
    tp = _choose_tile_p(P, tile_p, K, N, itemsize)
    grid = (B, pl.cdiv(P, tp))

    cost = pl.CostEstimate(
        flops=2 * B * P * K * N,
        transcendentals=0,
        bytes_accessed=(B * P * K + N * K + B * P * N) * itemsize + N * 4,
    )

    out = pl.pallas_call(
        _expand_linear_kernel,
        out_shape=jax.ShapeDtypeStruct((B, N, P), x.dtype),
        grid=grid,
        in_specs=[
            pl.BlockSpec((1, K, tp), lambda bi, pi: (bi, 0, pi)),  # activation tile
            pl.BlockSpec((N, K), lambda bi, pi: (0, 0)),           # weight (stays resident)
            pl.BlockSpec((N, 1), lambda bi, pi: (0, 0)),           # bias   (stays resident)
        ],
        out_specs=pl.BlockSpec((1, N, tp), lambda bi, pi: (bi, 0, pi)),
        compiler_params=pltpu.CompilerParams(
            dimension_semantics=("parallel", "parallel"),
            vmem_limit_bytes=32 * 1024 * 1024,
        ),
        cost_estimate=cost,
    )(rows, w, b)

    # Channel-major already -> plain contiguous reshape, no transpose pass.
    return out.reshape(B, N, new_h, new_w)


def patch_expanding_reference(x, weight, bias, upscaling_factor=2):
    """Pure-JAX f32 reference mirroring the PyTorch module step-by-step."""
    u = upscaling_factor
    B, C, H, W = x.shape
    K = C // (u * u)
    xr = x.astype(jnp.float32).reshape(B, K, u, u, H, W)
    xr = jnp.transpose(xr, (0, 1, 4, 2, 5, 3)).reshape(B, K, H * u, W * u)
    xr = jnp.transpose(xr, (0, 2, 3, 1))                                   # NHWC
    y = jnp.dot(xr, weight.astype(jnp.float32).T,
                precision=jax.lax.Precision.HIGHEST) + bias.astype(jnp.float32)
    return jnp.transpose(y, (0, 3, 1, 2))                                  # NCHW


def init_params(key, in_channels, out_channels, upscaling_factor=2):
    u = upscaling_factor
    k_in = in_channels // (u * u)
    kw, kb = jax.random.split(key)
    bound = 1.0 / jnp.sqrt(jnp.float32(k_in))
    # torch nn.Linear layout: weight [out_features, in_features]
    weight = jax.random.uniform(kw, (out_channels, k_in), jnp.float32, -bound, bound)
    bias = jax.random.uniform(kb, (out_channels,), jnp.float32, -bound, bound)
    return weight, bias


if __name__ == "__main__":
    key = jax.random.PRNGKey(0)
    kx, kp = jax.random.split(key)

    B, C, H, W = 2, 64, 16, 16     # in_channels=64, upscaling_factor=2 -> K=16
    u = 2
    out_channels = 128             # P = (H*u)*(W*u) = 1024 -> lane-dense spatial tiles

    x = jax.random.normal(kx, (B, C, H, W), jnp.float32)
    weight, bias = init_params(kp, C, out_channels, u)
    y_ref = patch_expanding_reference(x, weight, bias, u)

    # f32 path (tolerance covers TPU matmul precision differences between the
    # XLA HIGHEST-precision reference dot and the Mosaic dot).
    y = jax.block_until_ready(patch_expanding_forward(x, weight, bias, u))
    assert y.shape == (B, out_channels, H * u, W * u)
    assert jnp.allclose(y, y_ref, atol=1e-2, rtol=1e-2), "f32 mismatch vs reference"

    # bf16 fast path: bf16 rows/weight/output, f32 accumulation + f32 bias add.
    y_bf16 = jax.block_until_ready(
        patch_expanding_forward(x.astype(jnp.bfloat16), weight, bias, u))
    assert y_bf16.dtype == jnp.bfloat16
    assert jnp.allclose(y_bf16.astype(jnp.float32), y_ref, atol=1e-1, rtol=1e-1), \
        "bf16 mismatch vs reference"

    print("KERNEL_OK")
</pallas_src>

<mosaic_0001>
module attributes {stable_mosaic.version = 11 : i64} {
  func.func @_expand_linear_kernel(%arg0: i32, %arg1: i32, %arg2: memref<1x16x1024xf32, #tpu.memory_space<vmem>>, %arg3: memref<128x16xf32, #tpu.memory_space<vmem>>, %arg4: memref<128x1xf32, #tpu.memory_space<vmem>>, %arg5: memref<1x128x1024xf32, #tpu.memory_space<vmem>>) attributes {dimension_semantics = [#tpu.dimension_semantics<parallel>, #tpu.dimension_semantics<parallel>], iteration_bounds = array<i64: 2, 1>, scalar_prefetch = 0 : i64, scratch_operands = 0 : i64, tpu.core_type = #tpu.core_type<tc>, window_params = [{transform_indices = @transform_0, window_bounds = array<i64: 1, 16, 1024>}, {pipeline_mode = #tpu.pipeline_mode<synchronous>, transform_indices = @transform_1, window_bounds = array<i64: 128, 16>}, {pipeline_mode = #tpu.pipeline_mode<synchronous>, transform_indices = @transform_2, window_bounds = array<i64: 128, 1>}, {transform_indices = @transform_3, window_bounds = array<i64: 1, 128, 1024>}]} {
    %c0 = arith.constant 0 : index
    %c0_0 = arith.constant 0 : index
    %0 = vector.load %arg3[%c0, %c0_0] : memref<128x16xf32, #tpu.memory_space<vmem>>, vector<128x16xf32>
    %c0_1 = arith.constant 0 : index
    %c0_2 = arith.constant 0 : index
    %c0_3 = arith.constant 0 : index
    %1 = vector.load %arg2[%c0_1, %c0_2, %c0_3] : memref<1x16x1024xf32, #tpu.memory_space<vmem>>, vector<1x16x1024xf32>
    %2 = vector.shape_cast %1 : vector<1x16x1024xf32> to vector<16x1024xf32>
    %cst = arith.constant dense<0.000000e+00> : vector<128x1024xf32>
    %3 = tpu.matmul %0, %2, %cst {dimension_numbers = #tpu.dot_dimension_numbers<[1], [0], [0], [1], [0, 0, 1, 1], [], []>} : vector<128x16xf32>, vector<16x1024xf32>, vector<128x1024xf32> -> vector<128x1024xf32>
    %c0_4 = arith.constant 0 : index
    %c0_5 = arith.constant 0 : index
    %4 = vector.load %arg4[%c0_4, %c0_5] : memref<128x1xf32, #tpu.memory_space<vmem>>, vector<128x1xf32>
    %5 = vector.broadcast %4 : vector<128x1xf32> to vector<128x1024xf32>
    %6 = arith.addf %3, %5 : vector<128x1024xf32>
    %c0_6 = arith.constant 0 : index
    %c0_7 = arith.constant 0 : index
    %c0_8 = arith.constant 0 : index
    %7 = vector.load %arg5[%c0_6, %c0_7, %c0_8] : memref<1x128x1024xf32, #tpu.memory_space<vmem>>, vector<1x128x1024xf32>
    %8 = vector.shape_cast %7 : vector<1x128x1024xf32> to vector<128x1024xf32>
    %9 = vector.shape_cast %6 : vector<128x1024xf32> to vector<1x128x1024xf32>
    tpu.vector_store %arg5[%c0_6, %c0_7, %c0_8], %9 {strides = array<i32>} : memref<1x128x1024xf32, #tpu.memory_space<vmem>>, vector<1x128x1024xf32>,
    return
  }
  func.func @transform_0(%arg0: i32, %arg1: i32) -> (i32, i32, i32) {
    %c0_i32 = arith.constant 0 : i32
    %c0_i32_0 = arith.constant 0 : i32
    return %arg0, %c0_i32, %arg1 : i32, i32, i32
  }
  func.func @transform_1(%arg0: i32, %arg1: i32) -> (i32, i32) {
    %c0_i32 = arith.constant 0 : i32
    %c0_i32_0 = arith.constant 0 : i32
    %c0_i32_1 = arith.constant 0 : i32
    return %c0_i32, %c0_i32_0 : i32, i32
  }
  func.func @transform_2(%arg0: i32, %arg1: i32) -> (i32, i32) {
    %c0_i32 = arith.constant 0 : i32
    %c0_i32_0 = arith.constant 0 : i32
    %c0_i32_1 = arith.constant 0 : i32
    return %c0_i32, %c0_i32_0 : i32, i32
  }
  func.func @transform_3(%arg0: i32, %arg1: i32) -> (i32, i32, i32) {
    %c0_i32 = arith.constant 0 : i32
    %c0_i32_0 = arith.constant 0 : i32
    return %arg0, %c0_i32, %arg1 : i32, i32, i32
  }
}

</mosaic_0001>

<bundles_post_ra>
// kernel: tpu_custom_call.1
= control target key start
LH: loop header
LB: loop body
LE: loop exit
PB: predicated region body
PF: predicated region fallthrough
CT: control target
= control target key end

     0   :  { %8 = vsyncpa [#allocation3], 0  ;;  %s2253_s0 = inlined_call_operand.vmem [shape: f32[2,16,1024], index: 0, kind: input, shape index: {}]   ;;  %s2254_s1 = inlined_call_operand.vmem [shape: f32[128,16], index: 1, kind: input, shape index: {}]   ;;  %s2255_s2 = inlined_call_operand.vmem [shape: f32[128,1], index: 2, kind: input, shape index: {}]   ;;  %s2256_s3 = inlined_call_operand.hbm [shape: f32[2,128,1024], index: 3, kind: output, shape index: {}]  }
   0x1   :  { %10 = vsyncpa [#allocation3 + $0x1], 0  ;;  %s1505_s12 = smov 0   ;;  %s1507_s13 = smov 0  }
   0x2   :  { %s1509_s14 = smov 0   ;;  %s1511_s15 = smov 0  }
   0x3   :  { %s1513_s16 = smov 0   ;;  %s1515_s17 = smov 0  }
   0x4 LB: > { %s1244_s18 = sadd.s32 4294967295, %s1478_s17   ;;  %s1245_s19 = sadd.s32 4294967294, %s1478_s17   ;;  %s1478_s17 = sphi %s1515_s17, %s16_s17   ;;  %s1474_s16 = sphi %s1513_s16, %s2263_s16   ;;  %s1470_s15 = sphi %s1511_s15, %s2262_s15   ;;  %s1466_s14 = sphi %s1509_s14, %s2261_s14   ;;  %s1462_s13 = sphi %s1507_s13, %s2260_s13   ;;  %s1458_s12 = sphi %s1505_s12, %s2259_s12  }
   0x5   : > { %s28_s20 = sadd.s32 1, %s1474_s16  ;;  %s107_s21 = sadd.s32 1, %s1466_s14 }
   0x6   : > { %p30_p0 = scmp.ge.s32.totalorder %s28_s20, 2  ;;  %p117_p1 = scmp.ne.s32.totalorder %s1466_s14, %s1462_s13 }
   0x7   : > { %p118_p2 = scmp.eq.s32.totalorder %s1244_s18, 1  ;;  %p123_p3 = scmp.ne.s32.totalorder %s1462_s13, %s1458_s12 }
   0x8   : > { %s2265_s20 = smov (%p30_p0, %s28_s20), 0  ;;  %p124_p5 = scmp.eq.s32.totalorder %s1245_s19, 1 }
   0x9   : > { %p1545_p4 = por %p118_p2, %p117_p1  ;;  %s102_s23 = ssub.s32 %s1474_s16, %s2265_s20 }
   0xa   : > { %p1248_p6 = scmp.ge.s32.totalorder %s1478_s17, 1  ;;  %p105_p7 = scmp.eq.s32.totalorder %s102_s23, 0 }
   0xb   : > { %p1552_p8 = por %p124_p5, %p123_p3  ;;  %p161_p9 = scmp.lt.s32.totalorder %s1478_s17, 3 }
   0xc   : > { %s1558_s25 = scalar_select %p105_p7, %s1466_s14, %s107_s21  }
   0xd   : > { %p162_p10 = pnand %p1248_p6, %p161_p9 }
   0xe   : > { %p190_p11 = scmp.lt.s32.totalorder (!%p162_p10), %s1470_s15, 1  ;;  %v1480_v0 = vmov (!%p162_p10), 0.0   ;;  %v1481_v1 = vmov (!%p162_p10), 0   ;;  %v232_v2 = vld [vmem:[%s2255_s2] sm:$0xff] (!%p162_p10)  ;;  %v233_v6 = vld [vmem:[%s2255_s2 + $0x8] sm:$0xff] (!%p162_p10)  ;;  %vm328_vm0 = vcmask (!%p162_p10), 130048  }
   0xf   : > { %165 = sbr.rel (%p162_p10) target bundleno = 389 (0x185), region = 32  ;;  %441 = vmatprep.mubr.f32.mxu0 (!%p162_p10), %v1480_v0  ;;  %602 = vmatprep.mubr.f32.mxu1 (!%p162_p10), %v1480_v0  ;;  %v1586_v15 = vld [vmem:[%s2254_s1] sm:$0xff] (!%p162_p10)  ;;  %v234_v28 = vld [vmem:[%s2255_s2 + $0x10] sm:$0xff] (!%p162_p10)  ;;  %v1609_v31 = vld [vmem:[%s2254_s1 + $0x8] sm:$0xff] (!%p162_p10)  ;;  %s1482_s9 = smov (!%p162_p10), [#allocation2]  }
  0x10   : > { %1398 = vset.pattern.permute.xlu0 (!%p162_p10), %v1481_v1  ;;  %1399 = vset.pattern.permute.xlu1 (!%p162_p10), %v1481_v1  ;;  %v236_v30 = vld [vmem:[%s2255_s2 + $0x20] sm:$0xff] (!%p162_p10)  ;;  %v235_v32 = vld [vmem:[%s2255_s2 + $0x18] sm:$0xff] (!%p162_p10)  ;;  %v238_v33 = vld [vmem:[%s2255_s2 + $0x30] sm:$0xff] (!%p162_p10)  ;;  %s1404_s10 = sshll.u32 (!%p162_p10), %s1482_s9, 4  ;;  %s1405_s10 = int_to_ptr.vmem [resolvable:$false] %s1404_s10 }
  0x11   : > { %250 = vperm.xlu0 (!%p162_p10), %1398, %v232_v2   ;;  %260 = vperm.xlu1 (!%p162_p10), %1399, %v234_v28   ;;  %v1627_v34 = vld [vmem:[%s2254_s1 + $0x10] sm:$0xff] (!%p162_p10)  ;;  %v237_v35 = vld [vmem:[%s2255_s2 + $0x28] sm:$0xff] (!%p162_p10)  ;;  %v240_v36 = vld [vmem:[%s2255_s2 + $0x40] sm:$0xff] (!%p162_p10)  ;;  %s1406_s11 = scalar_lea.vmem (!%p162_p10), %s1405_s10, 32768 }
  0x12   : > { %v1644_v37 = vld [vmem:[%s2254_s1 + $0x18] sm:$0xff] (!%p162_p10)  ;;  %v242_v39 = vld [vmem:[%s2255_s2 + $0x50] sm:$0xff] (!%p162_p10)  ;;  %v1661_v40 = vld [vmem:[%s2254_s1 + $0x20] sm:$0xff] (!%p162_p10) }
  0x13   : > { %v239_v38 = vld [vmem:[%s2255_s2 + $0x38] sm:$0xff] (!%p162_p10)  ;;  %v241_v41 = vld [vmem:[%s2255_s2 + $0x48] sm:$0xff] (!%p162_p10)  ;;  %v244_v42 = vld [vmem:[%s2255_s2 + $0x60] sm:$0xff] (!%p162_p10) }
  0x14   : > { %v1678_v43 = vld [vmem:[%s2254_s1 + $0x28] sm:$0xff] (!%p162_p10)  ;;  %v243_v44 = vld [vmem:[%s2255_s2 + $0x58] sm:$0xff] (!%p162_p10)  ;;  %v246_v45 = vld [vmem:[%s2255_s2 + $0x70] sm:$0xff] (!%p162_p10) }
  0x15   : > { %255 = vperm.xlu0 (!%p162_p10), %1398, %v233_v6   ;;  %265 = vperm.xlu1 (!%p162_p10), %1399, %v235_v32   ;;  %v1695_v46 = vld [vmem:[%s2254_s1 + $0x30] sm:$0xff] (!%p162_p10)  ;;  %v245_v47 = vld [vmem:[%s2255_s2 + $0x68] sm:$0xff] (!%p162_p10)  ;;  %v1709_v48 = vld [vmem:[%s2254_s1 + $0x38] sm:$0xff] (!%p162_p10) }
  0x16   : > { %s191_s26 = scalar_select %p190_p11, %s1470_s15, 1  ;;  %v247_v49 = vld [vmem:[%s2255_s2 + $0x78] sm:$0xff]  ;;  %v1723_v50 = vld [vmem:[%s2254_s1 + $0x40] sm:$0xff]  ;;  %v1734_v51 = vld [vmem:[%s2254_s1 + $0x48] sm:$0xff] }
  0x17   : > { %v1745_v52 = vld [vmem:[%s2254_s1 + $0x50] sm:$0xff]  ;;  %v1756_v53 = vld [vmem:[%s2254_s1 + $0x58] sm:$0xff]  ;;  %v1767_v54 = vld [vmem:[%s2254_s1 + $0x60] sm:$0xff] }
  0x18   : > { %s1321_s27 = sshll.u32 %s191_s26, 7  ;;  %v1778_v55 = vld [vmem:[%s2254_s1 + $0x68] sm:$0xff]  ;;  %v1789_v56 = vld [vmem:[%s2254_s1 + $0x70] sm:$0xff]  ;;  %v1800_v57 = vld [vmem:[%s2254_s1 + $0x78] sm:$0xff] }
  0x19   : > { %s1567_s30 = scalar_lea.vmem %s2253_s0, %s1321_s27  ;;  %270 = vperm.xlu0 %1398, %v236_v30   ;;  %275 = vperm.xlu1 %1399, %v237_v35   ;;  %s186_s27 = sand.u32 1, %s1462_s13  }
  0x1a   : > { %v217_v3 = vld [vmem:[%s1567_s30 + $0x8] sm:$0xff]  ;;  %v219_v5 = vld [vmem:[%s1567_s30 + $0x18] sm:$0xff]  ;;  %v216_v9 = vld [vmem:[%s1567_s30] sm:$0xff]  ;;  %s1249_s28 = sshll.u32 %s186_s27, 10  ;;  %s2207_s7 = scalar_lea.sflag [#allocation3], %s186_s27 }
  0x1b   : > { %v225_v4 = vld [vmem:[%s1567_s30 + $0x48] sm:$0xff]  ;;  %v227_v8 = vld [vmem:[%s1567_s30 + $0x58] sm:$0xff]  ;;  %v224_v10 = vld [vmem:[%s1567_s30 + $0x40] sm:$0xff]  ;;  %s1913_s29 = scalar_lea.vmem [#allocation2], %s1249_s28 }
  0x1c   : > { %v1323_v7 = vpack.c.bf16 %v225_v4, %v217_v3  ;;  %v1327_v11 = vpack.c.bf16 %v227_v8, %v219_v5  ;;  %v1325_v12 = vpack.c.bf16 %v224_v10, %v216_v9  ;;  %v218_v13 = vld [vmem:[%s1567_s30 + $0x10] sm:$0xff]  ;;  %v221_v16 = vld [vmem:[%s1567_s30 + $0x28] sm:$0xff]  ;;  %v223_v19 = vld [vmem:[%s1567_s30 + $0x38] sm:$0xff]  ;;  %s1165_s4 = sshll.u32 %s1913_s29, 4  ;;  %s2198_s4 = int_to_ptr.vmem [resolvable:$true] %s1165_s4 }
  0x1d   : > { %v226_v14 = vld [vmem:[%s1567_s30 + $0x50] sm:$0xff]  ;;  %v229_v18 = vld [vmem:[%s1567_s30 + $0x68] sm:$0xff]  ;;  %v231_v20 = vld [vmem:[%s1567_s30 + $0x78] sm:$0xff]  ;;  %280 = vperm.xlu0 %1398, %v238_v33   ;;  %285 = vperm.xlu1 %1399, %v239_v38   ;;  %s1400_s8 = scalar_lea.vmem %s2198_s4, 16384  ;;  %p1407_p1 = scmp.lt.s32.totalorder %s2198_s4, %s1405_s10 }
  0x1e   : > { %1324 = vmatprep.subr.bf16.mxu0 %v1323_v7  ;;  %v1329_v17 = vpack.c.bf16 %v226_v14, %v218_v13  ;;  %1328 = vmatprep.subr.bf16.mxu1 %v1327_v11  ;;  %v1331_v21 = vpack.c.bf16 %v229_v18, %v221_v16  ;;  %v1335_v22 = vpack.c.bf16 %v231_v20, %v223_v19  ;;  %v220_v23 = vld [vmem:[%s1567_s30 + $0x20] sm:$0xff]  ;;  %v222_v25 = vld [vmem:[%s1567_s30 + $0x30] sm:$0xff]  ;;  %p1401_p12 = scmp.ne.s32.totalorder %s2198_s4, %s1400_s8  ;;  %p1408_p2 = scmp.lt.s32.totalorder %s1406_s11, %s1400_s8 }
  0x1f   : > { %1326 = vmatpush1.bf16.msra.mxu0 %v1325_v12  ;;  %v228_v24 = vld [vmem:[%s1567_s30 + $0x60] sm:$0xff]  ;;  %v230_v27 = vld [vmem:[%s1567_s30 + $0x70] sm:$0xff]  ;;  %s1322_s30 = sshll.u32 %s1470_s15, 14 }
  0x20   : > { %1330 = vmatpush1.bf16.msra.mxu1 %v1329_v17  ;;  %v1333_v26 = vpack.c.bf16 %v228_v24, %v220_v23  ;;  %1332 = vmatprep.subr.bf16.mxu0 %v1331_v21  ;;  %v1337_v29 = vpack.c.bf16 %v230_v27, %v222_v25  ;;  %s2196_s6 = scalar_lea.hbm %s2256_s3, %s1322_s30  ;;  %p1402_p13 = pnand %p1401_p12, %p1545_p4 }
  0x21   : > { %1336 = vmatprep.subr.bf16.mxu1 %v1335_v22  ;;  %290 = vperm.xlu0 %1398, %v240_v36   ;;  %p1409_p3 = por %p1408_p2, %p1407_p1 }
  0x22   : > { %1252 = vmatmul.mubr.msk.f32.vlgmr.msra.gmra.mrb[0].mxu0 %vm328_vm0, %v1586_v15  ;;  %295 = vperm.xlu1 %1399, %v241_v41   ;;  %p1403_p0 = pneg %p1402_p13 }
  0x23   : > { %1268 = vmatmul.mubr.msk.f32.vlgmr.msra.gmra.mrb[0].mxu1 %vm328_vm0, %v1586_v15  ;;  %1334 = vmatpush1.bf16.msra.mxu0 %v1333_v26 }
  0x24   : > { %1338 = vmatpush1.bf16.msra.mxu1 %v1337_v29  ;;  %447 = vmatprep.mubr.f32.mxu0 %v1480_v0  ;;  %p1410_p5 = pnand %p1409_p3, %p1403_p0 }
  0x25   : > { %608 = vmatprep.mubr.f32.mxu1 %v1480_v0  ;;  %300 = vperm.xlu0 %1398, %v242_v39  }
  0x26   : > { %1253 = vmatmul.mubr.msk.f32.gmra.mrb[2].mxu0 %vm328_vm0, %v1609_v31  ;;  %305 = vperm.xlu1 %1399, %v243_v44  }
  0x27   : > { %1269 = vmatmul.mubr.msk.f32.gmra.mrb[2].mxu1 %vm328_vm0, %v1609_v31  ;;  %453 = vmatprep.mubr.f32.mxu0 %v1480_v0 }
  0x28   : > { %614 = vmatprep.mubr.f32.mxu1 %v1480_v0 }
  0x29   : > { %310 = vperm.xlu0 %1398, %v244_v42  }
  0x2a   : > { %1254 = vmatmul.mubr.msk.f32.gmra.mrb[4].mxu0 %vm328_vm0, %v1627_v34  ;;  %315 = vperm.xlu1 %1399, %v245_v47  }
  0x2b   : > { %1270 = vmatmul.mubr.msk.f32.gmra.mrb[4].mxu1 %vm328_vm0, %v1627_v34  ;;  %459 = vmatprep.mubr.f32.mxu0 %v1480_v0 }
  0x2c   : > { %620 = vmatprep.mubr.f32.mxu1 %v1480_v0 }
  0x2d   : > { %320 = vperm.xlu0 %1398, %v246_v45  }
  0x2e   : > { %1255 = vmatmul.mubr.msk.f32.gmra.mrb[6].mxu0 %vm328_vm0, %v1644_v37  ;;  %325 = vperm.xlu1 %1399, %v247_v49  }
  0x2f   : > { %1271 = vmatmul.mubr.msk.f32.gmra.mrb[6].mxu1 %vm328_vm0, %v1644_v37  ;;  %465 = vmatprep.mubr.f32.mxu0 %v1480_v0 }
  0x30   : > { %626 = vmatprep.mubr.f32.mxu1 %v1480_v0 }
  0x32   : > { %1256 = vmatmul.mubr.msk.f32.gmra.mrb[8].mxu0 %vm328_vm0, %v1661_v40 }
  0x33   : > { %1272 = vmatmul.mubr.msk.f32.gmra.mrb[8].mxu1 %vm328_vm0, %v1661_v40  ;;  %471 = vmatprep.mubr.f32.mxu0 %v1480_v0 }
  0x34   : > { %632 = vmatprep.mubr.f32.mxu1 %v1480_v0 }
  0x36   : > { %1257 = vmatmul.mubr.msk.f32.gmra.mrb[10].mxu0 %vm328_vm0, %v1678_v43 }
  0x37   : > { %1273 = vmatmul.mubr.msk.f32.gmra.mrb[10].mxu1 %vm328_vm0, %v1678_v43  ;;  %477 = vmatprep.mubr.f32.mxu0 %v1480_v0 }
  0x38   : > { %638 = vmatprep.mubr.f32.mxu1 %v1480_v0 }
  0x3a   : > { %1258 = vmatmul.mubr.msk.f32.gmra.mrb[12].mxu0 %vm328_vm0, %v1695_v46 }
  0x3b   : > { %1274 = vmatmul.mubr.msk.f32.gmra.mrb[12].mxu1 %vm328_vm0, %v1695_v46  ;;  %483 = vmatprep.mubr.f32.mxu0 %v1480_v0 }
  0x3c   : > { %644 = vmatprep.mubr.f32.mxu1 %v1480_v0 }
  0x3e   : > { %1259 = vmatmul.mubr.msk.f32.gmra.mrb[14].mxu0 %vm328_vm0, %v1709_v48 }
  0x3f   : > { %1275 = vmatmul.mubr.msk.f32.gmra.mrb[14].mxu1 %vm328_vm0, %v1709_v48  ;;  %489 = vmatprep.mubr.f32.mxu0 %v1480_v0 }
  0x40   : > { %650 = vmatprep.mubr.f32.mxu1 %v1480_v0 }
  0x42   : > { %1260 = vmatmul.mubr.msk.f32.gmra.mrb[16].mxu0 %vm328_vm0, %v1723_v50 }
  0x43   : > { %1276 = vmatmul.mubr.msk.f32.gmra.mrb[16].mxu1 %vm328_vm0, %v1723_v50  ;;  %495 = vmatprep.mubr.f32.mxu0 %v1480_v0 }
  0x44   : > { %656 = vmatprep.mubr.f32.mxu1 %v1480_v0 }
  0x46   : > { %1261 = vmatmul.mubr.msk.f32.gmra.mrb[18].mxu0 %vm328_vm0, %v1734_v51 }
  0x47   : > { %1277 = vmatmul.mubr.msk.f32.gmra.mrb[18].mxu1 %vm328_vm0, %v1734_v51  ;;  %501 = vmatprep.mubr.f32.mxu0 %v1480_v0 }
  0x48   : > { %662 = vmatprep.mubr.f32.mxu1 %v1480_v0 }
  0x4a   : > { %1262 = vmatmul.mubr.msk.f32.gmra.mrb[20].mxu0 %vm328_vm0, %v1745_v52 }
  0x4b   : > { %1278 = vmatmul.mubr.msk.f32.gmra.mrb[20].mxu1 %vm328_vm0, %v1745_v52  ;;  %507 = vmatprep.mubr.f32.mxu0 %v1480_v0 }
  0x4c   : > { %668 = vmatprep.mubr.f32.mxu1 %v1480_v0 }
  0x4e   : > { %1263 = vmatmul.mubr.msk.f32.gmra.mrb[22].mxu0 %vm328_vm0, %v1756_v53 }
  0x4f   : > { %1279 = vmatmul.mubr.msk.f32.gmra.mrb[22].mxu1 %vm328_vm0, %v1756_v53  ;;  %513 = vmatprep.mubr.f32.mxu0 %v1480_v0 }
  0x50   : > { %674 = vmatprep.mubr.f32.mxu1 %v1480_v0 }
  0x52   : > { %1264 = vmatmul.mubr.msk.f32.gmra.mrb[24].mxu0 %vm328_vm0, %v1767_v54 }
  0x53   : > { %1280 = vmatmul.mubr.msk.f32.gmra.mrb[24].mxu1 %vm328_vm0, %v1767_v54  ;;  %519 = vmatprep.mubr.f32.mxu0 %v1480_v0 }
  0x54   : > { %680 = vmatprep.mubr.f32.mxu1 %v1480_v0 }
  0x56   : > { %1265 = vmatmul.mubr.msk.f32.gmra.mrb[26].mxu0 %vm328_vm0, %v1778_v55 }
  0x57   : > { %1281 = vmatmul.mubr.msk.f32.gmra.mrb[26].mxu1 %vm328_vm0, %v1778_v55  ;;  %525 = vmatprep.mubr.f32.mxu0 %v1480_v0 }
  0x58   : > { %686 = vmatprep.mubr.f32.mxu1 %v1480_v0 }
  0x5a   : > { %1266 = vmatmul.mubr.msk.f32.gmra.mrb[28].mxu0 %vm328_vm0, %v1789_v56 }
  0x5b   : > { %1282 = vmatmul.mubr.msk.f32.gmra.mrb[28].mxu1 %vm328_vm0, %v1789_v56  ;;  %531 = vmatprep.mubr.f32.mxu0 %v1480_v0 }
  0x5c   : > { %692 = vmatprep.mubr.f32.mxu1 %v1480_v0 }
  0x5e   : > { %1267 = vmatmul.mubr.msk.f32.gmra.mrb[30].mxu0 %vm328_vm0, %v1800_v57 }
  0x5f   : > { %1283 = vmatmul.mubr.msk.f32.gmra.mrb[30].mxu1 %vm328_vm0, %v1800_v57  ;;  %763 = vmatprep.mubr.f32.mxu0 %v1480_v0 }
  0x60   : > { %924 = vmatprep.mubr.f32.mxu1 %v1480_v0 }
  0x62   : > { %1284 = vmatmul.mubr.msk.f32.vlgmr.msra.gmra.mrb[32].mxu0 %vm328_vm0, %v1586_v15 }
  0x63   : > { %1300 = vmatmul.mubr.msk.f32.vlgmr.msra.gmra.mrb[32].mxu1 %vm328_vm0, %v1586_v15  ;;  %769 = vmatprep.mubr.f32.mxu0 %v1480_v0 }
  0x64   : > { %930 = vmatprep.mubr.f32.mxu1 %v1480_v0 }
  0x66   : > { %1285 = vmatmul.mubr.msk.f32.gmra.mrb[34].mxu0 %vm328_vm0, %v1609_v31 }
  0x67   : > { %1301 = vmatmul.mubr.msk.f32.gmra.mrb[34].mxu1 %vm328_vm0, %v1609_v31  ;;  %775 = vmatprep.mubr.f32.mxu0 %v1480_v0 }
  0x68   : > { %936 = vmatprep.mubr.f32.mxu1 %v1480_v0 }
  0x6a   : > { %1286 = vmatmul.mubr.msk.f32.gmra.mrb[36].mxu0 %vm328_vm0, %v1627_v34 }
  0x6b   : > { %1302 = vmatmul.mubr.msk.f32.gmra.mrb[36].mxu1 %vm328_vm0, %v1627_v34  ;;  %781 = vmatprep.mubr.f32.mxu0 %v1480_v0 }
  0x6c   : > { %942 = vmatprep.mubr.f32.mxu1 %v1480_v0 }
  0x6e   : > { %1287 = vmatmul.mubr.msk.f32.gmra.mrb[38].mxu0 %vm328_vm0, %v1644_v37 }
  0x6f   : > { %1303 = vmatmul.mubr.msk.f32.gmra.mrb[38].mxu1 %vm328_vm0, %v1644_v37  ;;  %787 = vmatprep.mubr.f32.mxu0 %v1480_v0 }
  0x70   : > { %948 = vmatprep.mubr.f32.mxu1 %v1480_v0 }
  0x72   : > { %1288 = vmatmul.mubr.msk.f32.gmra.mrb[40].mxu0 %vm328_vm0, %v1661_v40 }
  0x73   : > { %1304 = vmatmul.mubr.msk.f32.gmra.mrb[40].mxu1 %vm328_vm0, %v1661_v40  ;;  %793 = vmatprep.mubr.f32.mxu0 %v1480_v0 }
  0x74   : > { %954 = vmatprep.mubr.f32.mxu1 %v1480_v0 }
  0x76   : > { %1289 = vmatmul.mubr.msk.f32.gmra.mrb[42].mxu0 %vm328_vm0, %v1678_v43 }
  0x77   : > { %1305 = vmatmul.mubr.msk.f32.gmra.mrb[42].mxu1 %vm328_vm0, %v1678_v43  ;;  %799 = vmatprep.mubr.f32.mxu0 %v1480_v0 }
  0x78   : > { %960 = vmatprep.mubr.f32.mxu1 %v1480_v0 }
  0x7a   : > { %1290 = vmatmul.mubr.msk.f32.gmra.mrb[44].mxu0 %vm328_vm0, %v1695_v46 }
  0x7b   : > { %1306 = vmatmul.mubr.msk.f32.gmra.mrb[44].mxu1 %vm328_vm0, %v1695_v46  ;;  %805 = vmatprep.mubr.f32.mxu0 %v1480_v0 }
  0x7c   : > { %966 = vmatprep.mubr.f32.mxu1 %v1480_v0 }
  0x7e   : > { %1291 = vmatmul.mubr.msk.f32.gmra.mrb[46].mxu0 %vm328_vm0, %v1709_v48 }
  0x7f   : > { %1307 = vmatmul.mubr.msk.f32.gmra.mrb[46].mxu1 %vm328_vm0, %v1709_v48  ;;  %811 = vmatprep.mubr.f32.mxu0 %v1480_v0 }
  0x80   : > { %972 = vmatprep.mubr.f32.mxu1 %v1480_v0 }
  0x82   : > { %1292 = vmatmul.mubr.msk.f32.gmra.mrb[48].mxu0 %vm328_vm0, %v1723_v50 }
  0x83   : > { %1308 = vmatmul.mubr.msk.f32.gmra.mrb[48].mxu1 %vm328_vm0, %v1723_v50  ;;  %817 = vmatprep.mubr.f32.mxu0 %v1480_v0 }
  0x84   : > { %978 = vmatprep.mubr.f32.mxu1 %v1480_v0 }
  0x86   : > { %1293 = vmatmul.mubr.msk.f32.gmra.mrb[50].mxu0 %vm328_vm0, %v1734_v51 }
  0x87   : > { %1309 = vmatmul.mubr.msk.f32.gmra.mrb[50].mxu1 %vm328_vm0, %v1734_v51  ;;  %823 = vmatprep.mubr.f32.mxu0 %v1480_v0 }
  0x88   : > { %984 = vmatprep.mubr.f32.mxu1 %v1480_v0 }
  0x8a   : > { %1294 = vmatmul.mubr.msk.f32.gmra.mrb[52].mxu0 %vm328_vm0, %v1745_v52 }
  0x8b   : > { %1310 = vmatmul.mubr.msk.f32.gmra.mrb[52].mxu1 %vm328_vm0, %v1745_v52  ;;  %829 = vmatprep.mubr.f32.mxu0 %v1480_v0 }
  0x8c   : > { %990 = vmatprep.mubr.f32.mxu1 %v1480_v0 }
  0x8e   : > { %1295 = vmatmul.mubr.msk.f32.gmra.mrb[54].mxu0 %vm328_vm0, %v1756_v53 }
  0x8f   : > { %1311 = vmatmul.mubr.msk.f32.gmra.mrb[54].mxu1 %vm328_vm0, %v1756_v53  ;;  %835 = vmatprep.mubr.f32.mxu0 %v1480_v0 }
  0x90   : > { %996 = vmatprep.mubr.f32.mxu1 %v1480_v0  ;;  %v1904_v58 = vpop.permute.xlu0 %250  ;;  %v1919_v5 = vpop.permute.xlu1 %260 }
  0x92   : > { %1296 = vmatmul.mubr.msk.f32.gmra.mrb[56].mxu0 %vm328_vm0, %v1767_v54 }
  0x93   : > { %1312 = vmatmul.mubr.msk.f32.gmra.mrb[56].mxu1 %vm328_vm0, %v1767_v54  ;;  %841 = vmatprep.mubr.f32.mxu0 %v1480_v0 }
  0x94   : > { %1002 = vmatprep.mubr.f32.mxu1 %v1480_v0  ;;  %v1911_v2 = vpop.permute.xlu0 %255  ;;  %v1933_v20 = vpop.permute.xlu1 %265 }
  0x96   : > { %1297 = vmatmul.mubr.msk.f32.gmra.mrb[58].mxu0 %vm328_vm0, %v1778_v55 }
  0x97   : > { %1313 = vmatmul.mubr.msk.f32.gmra.mrb[58].mxu1 %vm328_vm0, %v1778_v55  ;;  %847 = vmatprep.mubr.f32.mxu0 %v1480_v0 }
  0x98   : > { %1008 = vmatprep.mubr.f32.mxu1 %v1480_v0  ;;  %v1943_v29 = vpop.permute.xlu0 %270  ;;  %v1953_v38 = vpop.permute.xlu1 %275 }
  0x9a   : > { %1298 = vmatmul.mubr.msk.f32.gmra.mrb[60].mxu0 %vm328_vm0, %v1789_v56 }
  0x9b   : > { %1314 = vmatmul.mubr.msk.f32.gmra.mrb[60].mxu1 %vm328_vm0, %v1789_v56  ;;  %853 = vmatprep.mubr.f32.mxu0 %v1480_v0 }
  0x9c   : > { %1014 = vmatprep.mubr.f32.mxu1 %v1480_v0  ;;  %v1963_v47 = vpop.permute.xlu0 %280  ;;  %v1973_v56 = vpop.permute.xlu1 %285 }
  0x9e   : > { %1299 = vmatmul.mubr.msk.f32.gmra.mrb[62].mxu0 %vm328_vm0, %v1800_v57 }
  0x9f   : > { %1315 = vmatmul.mubr.msk.f32.gmra.mrb[62].mxu1 %vm328_vm0, %v1800_v57 }
  0xf5   : > { %v443_v59 = vpop.f32.mrb[0].mxu0 }
  0xf6   : > { %v604_v60 = vpop.f32.mrb[0].mxu1  ;;  %v444_v61 = vadd.f32 %v443_v59, %v1904_v58  ;;  %v445_v62 = vpop.f32.mrb[1].mxu0 }
  0xf7   : > { %v605_v63 = vadd.f32 %v604_v60, %v1904_v58  ;;  %v446_v0 = vadd.f32 %v445_v62, %v1904_v58  ;;  %v606_v1 = vpop.f32.mrb[1].mxu1 }
  0xf8   : > { %1021 = vst [vmem:[%s1913_s29] sm:$0xff] %v444_v61  ;;  %v607_v3 = vadd.f32 %v606_v1, %v1904_v58 }
  0xf9   : > { %1023 = vst [vmem:[%s1913_s29 + $0x10] sm:$0xff] %v605_v63  ;;  %1022 = vst [vmem:[%s1913_s29 + $0x8] sm:$0xff] %v446_v0  ;;  %v449_v4 = vpop.f32.mrb[2].mxu0 }
  0xfa   : > { %1024 = vst [vmem:[%s1913_s29 + $0x18] sm:$0xff] %v607_v3  ;;  %v610_v6 = vpop.f32.mrb[2].mxu1  ;;  %v450_v7 = vadd.f32 %v449_v4, %v1911_v2  ;;  %v451_v8 = vpop.f32.mrb[3].mxu0 }
  0xfb   : > { %v611_v9 = vadd.f32 %v610_v6, %v1911_v2  ;;  %v452_v10 = vadd.f32 %v451_v8, %v1911_v2  ;;  %v612_v11 = vpop.f32.mrb[3].mxu1  ;;  %v1983_v3 = vpop.permute.xlu0 %290 }
  0xfc   : > { %1029 = vst [vmem:[%s1913_s29 + $0x40] sm:$0xff] %v450_v7  ;;  %v613_v12 = vadd.f32 %v612_v11, %v1911_v2 }
  0xfd   : > { %1031 = vst [vmem:[%s1913_s29 + $0x50] sm:$0xff] %v611_v9  ;;  %1030 = vst [vmem:[%s1913_s29 + $0x48] sm:$0xff] %v452_v10  ;;  %v455_v13 = vpop.f32.mrb[4].mxu0 }
  0xfe   : > { %1032 = vst [vmem:[%s1913_s29 + $0x58] sm:$0xff] %v613_v12  ;;  %v616_v14 = vpop.f32.mrb[4].mxu1  ;;  %v456_v15 = vadd.f32 %v455_v13, %v1919_v5  ;;  %v457_v16 = vpop.f32.mrb[5].mxu0 }
  0xff   : > { %v617_v17 = vadd.f32 %v616_v14, %v1919_v5  ;;  %v458_v18 = vadd.f32 %v457_v16, %v1919_v5  ;;  %v618_v19 = vpop.f32.mrb[5].mxu1  ;;  %v1993_v13 = vpop.permute.xlu1 %295 }
 0x100   : > { %1037 = vst [vmem:[%s1913_s29 + $0x80] sm:$0xff] %v456_v15  ;;  %v619_v21 = vadd.f32 %v618_v19, %v1919_v5 }
 0x101   : > { %1039 = vst [vmem:[%s1913_s29 + $0x90] sm:$0xff] %v617_v17  ;;  %1038 = vst [vmem:[%s1913_s29 + $0x88] sm:$0xff] %v458_v18  ;;  %v461_v22 = vpop.f32.mrb[6].mxu0 }
 0x102   : > { %1040 = vst [vmem:[%s1913_s29 + $0x98] sm:$0xff] %v619_v21  ;;  %v622_v23 = vpop.f32.mrb[6].mxu1  ;;  %v462_v24 = vadd.f32 %v461_v22, %v1933_v20  ;;  %v463_v25 = vpop.f32.mrb[7].mxu0 }
 0x103   : > { %v623_v26 = vadd.f32 %v622_v23, %v1933_v20  ;;  %v464_v27 = vadd.f32 %v463_v25, %v1933_v20  ;;  %v624_v28 = vpop.f32.mrb[7].mxu1  ;;  %v2003_v23 = vpop.permute.xlu0 %300 }
 0x104   : > { %1045 = vst [vmem:[%s1913_s29 + $0xc0] sm:$0xff] %v462_v24  ;;  %v625_v30 = vadd.f32 %v624_v28, %v1933_v20 }
 0x105   : > { %1047 = vst [vmem:[%s1913_s29 + $0xd0] sm:$0xff] %v623_v26  ;;  %1046 = vst [vmem:[%s1913_s29 + $0xc8] sm:$0xff] %v464_v27  ;;  %v467_v31 = vpop.f32.mrb[8].mxu0 }
 0x106   : > { %1048 = vst [vmem:[%s1913_s29 + $0xd8] sm:$0xff] %v625_v30  ;;  %v628_v32 = vpop.f32.mrb[8].mxu1  ;;  %v468_v33 = vadd.f32 %v467_v31, %v1943_v29  ;;  %v469_v34 = vpop.f32.mrb[9].mxu0 }
 0x107   : > { %v629_v35 = vadd.f32 %v628_v32, %v1943_v29  ;;  %v470_v36 = vadd.f32 %v469_v34, %v1943_v29  ;;  %v630_v37 = vpop.f32.mrb[9].mxu1 }
 0x108   : > { %1053 = vst [vmem:[%s1913_s29 + $0x100] sm:$0xff] %v468_v33  ;;  %v631_v39 = vadd.f32 %v630_v37, %v1943_v29  ;;  %v2013_v33 = vpop.permute.xlu1 %305 }
 0x109   : > { %1055 = vst [vmem:[%s1913_s29 + $0x110] sm:$0xff] %v629_v35  ;;  %1054 = vst [vmem:[%s1913_s29 + $0x108] sm:$0xff] %v470_v36  ;;  %v473_v40 = vpop.f32.mrb[10].mxu0 }
 0x10a   : > { %1056 = vst [vmem:[%s1913_s29 + $0x118] sm:$0xff] %v631_v39  ;;  %v634_v41 = vpop.f32.mrb[10].mxu1  ;;  %v474_v42 = vadd.f32 %v473_v40, %v1953_v38  ;;  %v475_v43 = vpop.f32.mrb[11].mxu0 }
 0x10b   : > { %v635_v44 = vadd.f32 %v634_v41, %v1953_v38  ;;  %v476_v45 = vadd.f32 %v475_v43, %v1953_v38  ;;  %v636_v46 = vpop.f32.mrb[11].mxu1  ;;  %v2023_v43 = vpop.permute.xlu0 %310 }
 0x10c   : > { %1061 = vst [vmem:[%s1913_s29 + $0x140] sm:$0xff] %v474_v42  ;;  %v637_v48 = vadd.f32 %v636_v46, %v1953_v38 }
 0x10d   : > { %1063 = vst [vmem:[%s1913_s29 + $0x150] sm:$0xff] %v635_v44  ;;  %1062 = vst [vmem:[%s1913_s29 + $0x148] sm:$0xff] %v476_v45  ;;  %v479_v49 = vpop.f32.mrb[12].mxu0 }
 0x10e   : > { %1064 = vst [vmem:[%s1913_s29 + $0x158] sm:$0xff] %v637_v48  ;;  %v640_v50 = vpop.f32.mrb[12].mxu1  ;;  %v480_v51 = vadd.f32 %v479_v49, %v1963_v47  ;;  %v481_v52 = vpop.f32.mrb[13].mxu0 }
 0x10f   : > { %v641_v53 = vadd.f32 %v640_v50, %v1963_v47  ;;  %v482_v54 = vadd.f32 %v481_v52, %v1963_v47  ;;  %v642_v55 = vpop.f32.mrb[13].mxu1 }
 0x110   : > { %1069 = vst [vmem:[%s1913_s29 + $0x180] sm:$0xff] %v480_v51  ;;  %v643_v57 = vadd.f32 %v642_v55, %v1963_v47 }
 0x111   : > { %1071 = vst [vmem:[%s1913_s29 + $0x190] sm:$0xff] %v641_v53  ;;  %1070 = vst [vmem:[%s1913_s29 + $0x188] sm:$0xff] %v482_v54  ;;  %v485_v59 = vpop.f32.mrb[14].mxu0  ;;  %v2033_v53 = vpop.permute.xlu1 %315 }
 0x112   : > { %1072 = vst [vmem:[%s1913_s29 + $0x198] sm:$0xff] %v643_v57  ;;  %v646_v60 = vpop.f32.mrb[14].mxu1  ;;  %v486_v61 = vadd.f32 %v485_v59, %v1973_v56  ;;  %v487_v62 = vpop.f32.mrb[15].mxu0 }
 0x113   : > { %v647_v63 = vadd.f32 %v646_v60, %v1973_v56  ;;  %v488_v0 = vadd.f32 %v487_v62, %v1973_v56  ;;  %v648_v1 = vpop.f32.mrb[15].mxu1 }
 0x114   : > { %1077 = vst [vmem:[%s1913_s29 + $0x1c0] sm:$0xff] %v486_v61  ;;  %v649_v4 = vadd.f32 %v648_v1, %v1973_v56 }
 0x115   : > { %1079 = vst [vmem:[%s1913_s29 + $0x1d0] sm:$0xff] %v647_v63  ;;  %1078 = vst [vmem:[%s1913_s29 + $0x1c8] sm:$0xff] %v488_v0  ;;  %v491_v6 = vpop.f32.mrb[16].mxu0  ;;  %v2043_v0 = vpop.permute.xlu0 %320 }
 0x116   : > { %1080 = vst [vmem:[%s1913_s29 + $0x1d8] sm:$0xff] %v649_v4  ;;  %v652_v7 = vpop.f32.mrb[16].mxu1  ;;  %v492_v8 = vadd.f32 %v491_v6, %v1983_v3  ;;  %v493_v9 = vpop.f32.mrb[17].mxu0 }
 0x117   : > { %v653_v10 = vadd.f32 %v652_v7, %v1983_v3  ;;  %v494_v11 = vadd.f32 %v493_v9, %v1983_v3  ;;  %v654_v12 = vpop.f32.mrb[17].mxu1 }
 0x118   : > { %1085 = vst [vmem:[%s1913_s29 + $0x200] sm:$0xff] %v492_v8  ;;  %v655_v14 = vadd.f32 %v654_v12, %v1983_v3  ;;  %v2053_v12 = vpop.permute.xlu1 %325 }
 0x119   : > { %1087 = vst [vmem:[%s1913_s29 + $0x210] sm:$0xff] %v653_v10  ;;  %1086 = vst [vmem:[%s1913_s29 + $0x208] sm:$0xff] %v494_v11  ;;  %v497_v15 = vpop.f32.mrb[18].mxu0 }
 0x11a   : > { %1088 = vst [vmem:[%s1913_s29 + $0x218] sm:$0xff] %v655_v14  ;;  %v658_v16 = vpop.f32.mrb[18].mxu1  ;;  %v498_v17 = vadd.f32 %v497_v15, %v1993_v13  ;;  %v499_v18 = vpop.f32.mrb[19].mxu0 }
 0x11b   : > { %v659_v19 = vadd.f32 %v658_v16, %v1993_v13  ;;  %v500_v21 = vadd.f32 %v499_v18, %v1993_v13  ;;  %v660_v22 = vpop.f32.mrb[19].mxu1 }
 0x11c   : > { %1093 = vst [vmem:[%s1913_s29 + $0x240] sm:$0xff] %v498_v17  ;;  %v661_v24 = vadd.f32 %v660_v22, %v1993_v13 }
 0x11d   : > { %1095 = vst [vmem:[%s1913_s29 + $0x250] sm:$0xff] %v659_v19  ;;  %1094 = vst [vmem:[%s1913_s29 + $0x248] sm:$0xff] %v500_v21  ;;  %v503_v25 = vpop.f32.mrb[20].mxu0 }
 0x11e   : > { %1096 = vst [vmem:[%s1913_s29 + $0x258] sm:$0xff] %v661_v24  ;;  %v664_v26 = vpop.f32.mrb[20].mxu1  ;;  %v504_v27 = vadd.f32 %v503_v25, %v2003_v23  ;;  %v505_v28 = vpop.f32.mrb[21].mxu0 }
 0x11f   : > { %v665_v30 = vadd.f32 %v664_v26, %v2003_v23  ;;  %v506_v31 = vadd.f32 %v505_v28, %v2003_v23  ;;  %v666_v32 = vpop.f32.mrb[21].mxu1 }
 0x120   : > { %1101 = vst [vmem:[%s1913_s29 + $0x280] sm:$0xff] %v504_v27  ;;  %v667_v34 = vadd.f32 %v666_v32, %v2003_v23 }
 0x121   : > { %1103 = vst [vmem:[%s1913_s29 + $0x290] sm:$0xff] %v665_v30  ;;  %1102 = vst [vmem:[%s1913_s29 + $0x288] sm:$0xff] %v506_v31  ;;  %v509_v35 = vpop.f32.mrb[22].mxu0 }
 0x122   : > { %1104 = vst [vmem:[%s1913_s29 + $0x298] sm:$0xff] %v667_v34  ;;  %v670_v36 = vpop.f32.mrb[22].mxu1  ;;  %v510_v37 = vadd.f32 %v509_v35, %v2013_v33  ;;  %v511_v39 = vpop.f32.mrb[23].mxu0 }
 0x123   : > { %v671_v40 = vadd.f32 %v670_v36, %v2013_v33  ;;  %v512_v41 = vadd.f32 %v511_v39, %v2013_v33  ;;  %v672_v42 = vpop.f32.mrb[23].mxu1 }
 0x124   : > { %1109 = vst [vmem:[%s1913_s29 + $0x2c0] sm:$0xff] %v510_v37  ;;  %v673_v44 = vadd.f32 %v672_v42, %v2013_v33 }
 0x125   : > { %1111 = vst [vmem:[%s1913_s29 + $0x2d0] sm:$0xff] %v671_v40  ;;  %1110 = vst [vmem:[%s1913_s29 + $0x2c8] sm:$0xff] %v512_v41  ;;  %v515_v45 = vpop.f32.mrb[24].mxu0 }
 0x126   : > { %1112 = vst [vmem:[%s1913_s29 + $0x2d8] sm:$0xff] %v673_v44  ;;  %v676_v46 = vpop.f32.mrb[24].mxu1  ;;  %v516_v48 = vadd.f32 %v515_v45, %v2023_v43  ;;  %v517_v49 = vpop.f32.mrb[25].mxu0 }
 0x127   : > { %v677_v50 = vadd.f32 %v676_v46, %v2023_v43  ;;  %v518_v51 = vadd.f32 %v517_v49, %v2023_v43  ;;  %v678_v52 = vpop.f32.mrb[25].mxu1 }
 0x128   : > { %1117 = vst [vmem:[%s1913_s29 + $0x300] sm:$0xff] %v516_v48  ;;  %v679_v54 = vadd.f32 %v678_v52, %v2023_v43 }
 0x129   : > { %1119 = vst [vmem:[%s1913_s29 + $0x310] sm:$0xff] %v677_v50  ;;  %1118 = vst [vmem:[%s1913_s29 + $0x308] sm:$0xff] %v518_v51  ;;  %v521_v55 = vpop.f32.mrb[26].mxu0 }
 0x12a   : > { %1120 = vst [vmem:[%s1913_s29 + $0x318] sm:$0xff] %v679_v54  ;;  %v682_v57 = vpop.f32.mrb[26].mxu1  ;;  %v522_v59 = vadd.f32 %v521_v55, %v2033_v53  ;;  %v523_v60 = vpop.f32.mrb[27].mxu0 }
 0x12b   : > { %v683_v61 = vadd.f32 %v682_v57, %v2033_v53  ;;  %v524_v62 = vadd.f32 %v523_v60, %v2033_v53  ;;  %v684_v63 = vpop.f32.mrb[27].mxu1 }
 0x12c   : > { %1125 = vst [vmem:[%s1913_s29 + $0x340] sm:$0xff] %v522_v59  ;;  %v685_v1 = vadd.f32 %v684_v63, %v2033_v53 }
 0x12d   : > { %1127 = vst [vmem:[%s1913_s29 + $0x350] sm:$0xff] %v683_v61  ;;  %1126 = vst [vmem:[%s1913_s29 + $0x348] sm:$0xff] %v524_v62  ;;  %v527_v4 = vpop.f32.mrb[28].mxu0 }
 0x12e   : > { %1128 = vst [vmem:[%s1913_s29 + $0x358] sm:$0xff] %v685_v1  ;;  %v688_v6 = vpop.f32.mrb[28].mxu1  ;;  %v528_v7 = vadd.f32 %v527_v4, %v2043_v0  ;;  %v529_v8 = vpop.f32.mrb[29].mxu0 }
 0x12f   : > { %v689_v9 = vadd.f32 %v688_v6, %v2043_v0  ;;  %v530_v10 = vadd.f32 %v529_v8, %v2043_v0  ;;  %v690_v11 = vpop.f32.mrb[29].mxu1 }
 0x130   : > { %1133 = vst [vmem:[%s1913_s29 + $0x380] sm:$0xff] %v528_v7  ;;  %v691_v14 = vadd.f32 %v690_v11, %v2043_v0 }
 0x131   : > { %1135 = vst [vmem:[%s1913_s29 + $0x390] sm:$0xff] %v689_v9  ;;  %1134 = vst [vmem:[%s1913_s29 + $0x388] sm:$0xff] %v530_v10  ;;  %v533_v15 = vpop.f32.mrb[30].mxu0 }
 0x132   : > { %1136 = vst [vmem:[%s1913_s29 + $0x398] sm:$0xff] %v691_v14  ;;  %v694_v16 = vpop.f32.mrb[30].mxu1  ;;  %v534_v17 = vadd.f32 %v533_v15, %v2053_v12  ;;  %v535_v18 = vpop.f32.mrb[31].mxu0 }
 0x133   : > { %v695_v19 = vadd.f32 %v694_v16, %v2053_v12  ;;  %v536_v21 = vadd.f32 %v535_v18, %v2053_v12  ;;  %v696_v22 = vpop.f32.mrb[31].mxu1 }
 0x134   : > { %1141 = vst [vmem:[%s1913_s29 + $0x3c0] sm:$0xff] %v534_v17  ;;  %v697_v24 = vadd.f32 %v696_v22, %v2053_v12 }
 0x135   : > { %1143 = vst [vmem:[%s1913_s29 + $0x3d0] sm:$0xff] %v695_v19  ;;  %1142 = vst [vmem:[%s1913_s29 + $0x3c8] sm:$0xff] %v536_v21  ;;  %v765_v25 = vpop.f32.mrb[32].mxu0 }
 0x136   : > { %1144 = vst [vmem:[%s1913_s29 + $0x3d8] sm:$0xff] %v697_v24  ;;  %v766_v26 = vadd.f32 %v765_v25, %v1904_v58  ;;  %v926_v27 = vpop.f32.mrb[32].mxu1  ;;  %v767_v28 = vpop.f32.mrb[33].mxu0 }
 0x137   : > { %v927_v30 = vadd.f32 %v926_v27, %v1904_v58  ;;  %v768_v31 = vadd.f32 %v767_v28, %v1904_v58  ;;  %v928_v32 = vpop.f32.mrb[33].mxu1 }
 0x138   : > { %1025 = vst [vmem:[%s1913_s29 + $0x20] sm:$0xff] %v766_v26  ;;  %v929_v34 = vadd.f32 %v928_v32, %v1904_v58 }
 0x139   : > { %1027 = vst [vmem:[%s1913_s29 + $0x30] sm:$0xff] %v927_v30  ;;  %1026 = vst [vmem:[%s1913_s29 + $0x28] sm:$0xff] %v768_v31  ;;  %v771_v35 = vpop.f32.mrb[34].mxu0 }
 0x13a   : > { %1028 = vst [vmem:[%s1913_s29 + $0x38] sm:$0xff] %v929_v34  ;;  %v772_v36 = vadd.f32 %v771_v35, %v1911_v2  ;;  %v932_v37 = vpop.f32.mrb[34].mxu1  ;;  %v773_v39 = vpop.f32.mrb[35].mxu0 }
 0x13b   : > { %v933_v40 = vadd.f32 %v932_v37, %v1911_v2  ;;  %v774_v41 = vadd.f32 %v773_v39, %v1911_v2  ;;  %v934_v42 = vpop.f32.mrb[35].mxu1 }
 0x13c   : > { %1033 = vst [vmem:[%s1913_s29 + $0x60] sm:$0xff] %v772_v36  ;;  %v935_v58 = vadd.f32 %v934_v42, %v1911_v2 }
 0x13d   : > { %1035 = vst [vmem:[%s1913_s29 + $0x70] sm:$0xff] %v933_v40  ;;  %1034 = vst [vmem:[%s1913_s29 + $0x68] sm:$0xff] %v774_v41  ;;  %v777_v44 = vpop.f32.mrb[36].mxu0 }
 0x13e   : > { %1036 = vst [vmem:[%s1913_s29 + $0x78] sm:$0xff] %v935_v58  ;;  %v778_v45 = vadd.f32 %v777_v44, %v1919_v5  ;;  %v938_v46 = vpop.f32.mrb[36].mxu1  ;;  %v779_v48 = vpop.f32.mrb[37].mxu0 }
 0x13f   : > { %v939_v49 = vadd.f32 %v938_v46, %v1919_v5  ;;  %v780_v50 = vadd.f32 %v779_v48, %v1919_v5  ;;  %v940_v51 = vpop.f32.mrb[37].mxu1 }
 0x140   : > { %1041 = vst [vmem:[%s1913_s29 + $0xa0] sm:$0xff] %v778_v45  ;;  %v941_v2 = vadd.f32 %v940_v51, %v1919_v5 }
 0x141   : > { %1043 = vst [vmem:[%s1913_s29 + $0xb0] sm:$0xff] %v939_v49  ;;  %1042 = vst [vmem:[%s1913_s29 + $0xa8] sm:$0xff] %v780_v50  ;;  %v783_v52 = vpop.f32.mrb[38].mxu0 }
 0x142   : > { %1044 = vst [vmem:[%s1913_s29 + $0xb8] sm:$0xff] %v941_v2  ;;  %v784_v54 = vadd.f32 %v783_v52, %v1933_v20  ;;  %v944_v55 = vpop.f32.mrb[38].mxu1  ;;  %v785_v57 = vpop.f32.mrb[39].mxu0 }
 0x143   : > { %v945_v59 = vadd.f32 %v944_v55, %v1933_v20  ;;  %v786_v60 = vadd.f32 %v785_v57, %v1933_v20  ;;  %v946_v61 = vpop.f32.mrb[39].mxu1 }
 0x144   : > { %1049 = vst [vmem:[%s1913_s29 + $0xe0] sm:$0xff] %v784_v54  ;;  %v947_v5 = vadd.f32 %v946_v61, %v1933_v20 }
 0x145   : > { %1051 = vst [vmem:[%s1913_s29 + $0xf0] sm:$0xff] %v945_v59  ;;  %1050 = vst [vmem:[%s1913_s29 + $0xe8] sm:$0xff] %v786_v60  ;;  %v789_v62 = vpop.f32.mrb[40].mxu0 }
 0x146   : > { %1052 = vst [vmem:[%s1913_s29 + $0xf8] sm:$0xff] %v947_v5  ;;  %v790_v63 = vadd.f32 %v789_v62, %v1943_v29  ;;  %v950_v1 = vpop.f32.mrb[40].mxu1  ;;  %v791_v4 = vpop.f32.mrb[41].mxu0 }
 0x147   : > { %v951_v6 = vadd.f32 %v950_v1, %v1943_v29  ;;  %v792_v7 = vadd.f32 %v791_v4, %v1943_v29  ;;  %v952_v8 = vpop.f32.mrb[41].mxu1 }
 0x148   : > { %1057 = vst [vmem:[%s1913_s29 + $0x120] sm:$0xff] %v790_v63  ;;  %v953_v20 = vadd.f32 %v952_v8, %v1943_v29 }
 0x149   : > { %1059 = vst [vmem:[%s1913_s29 + $0x130] sm:$0xff] %v951_v6  ;;  %1058 = vst [vmem:[%s1913_s29 + $0x128] sm:$0xff] %v792_v7  ;;  %v795_v9 = vpop.f32.mrb[42].mxu0 }
 0x14a   : > { %1060 = vst [vmem:[%s1913_s29 + $0x138] sm:$0xff] %v953_v20  ;;  %v796_v10 = vadd.f32 %v795_v9, %v1953_v38  ;;  %v956_v11 = vpop.f32.mrb[42].mxu1  ;;  %v797_v14 = vpop.f32.mrb[43].mxu0 }
 0x14b   : > { %v957_v15 = vadd.f32 %v956_v11, %v1953_v38  ;;  %v798_v16 = vadd.f32 %v797_v14, %v1953_v38  ;;  %v958_v17 = vpop.f32.mrb[43].mxu1 }
 0x14c   : > { %1065 = vst [vmem:[%s1913_s29 + $0x160] sm:$0xff] %v796_v10  ;;  %v959_v29 = vadd.f32 %v958_v17, %v1953_v38 }
 0x14d   : > { %1067 = vst [vmem:[%s1913_s29 + $0x170] sm:$0xff] %v957_v15  ;;  %1066 = vst [vmem:[%s1913_s29 + $0x168] sm:$0xff] %v798_v16  ;;  %v801_v18 = vpop.f32.mrb[44].mxu0 }
 0x14e   : > { %1068 = vst [vmem:[%s1913_s29 + $0x178] sm:$0xff] %v959_v29  ;;  %v802_v19 = vadd.f32 %v801_v18, %v1963_v47  ;;  %v962_v21 = vpop.f32.mrb[44].mxu1  ;;  %v803_v22 = vpop.f32.mrb[45].mxu0 }
 0x14f   : > { %v963_v24 = vadd.f32 %v962_v21, %v1963_v47  ;;  %v804_v25 = vadd.f32 %v803_v22, %v1963_v47  ;;  %v964_v26 = vpop.f32.mrb[45].mxu1 }
 0x150   : > { %1073 = vst [vmem:[%s1913_s29 + $0x1a0] sm:$0xff] %v802_v19  ;;  %v965_v38 = vadd.f32 %v964_v26, %v1963_v47 }
 0x151   : > { %1075 = vst [vmem:[%s1913_s29 + $0x1b0] sm:$0xff] %v963_v24  ;;  %1074 = vst [vmem:[%s1913_s29 + $0x1a8] sm:$0xff] %v804_v25  ;;  %v807_v27 = vpop.f32.mrb[46].mxu0 }
 0x152   : > { %1076 = vst [vmem:[%s1913_s29 + $0x1b8] sm:$0xff] %v965_v38  ;;  %v808_v28 = vadd.f32 %v807_v27, %v1973_v56  ;;  %v968_v30 = vpop.f32.mrb[46].mxu1  ;;  %v809_v31 = vpop.f32.mrb[47].mxu0 }
 0x153   : > { %v969_v32 = vadd.f32 %v968_v30, %v1973_v56  ;;  %v810_v34 = vadd.f32 %v809_v31, %v1973_v56  ;;  %v970_v35 = vpop.f32.mrb[47].mxu1 }
 0x154   : > { %1081 = vst [vmem:[%s1913_s29 + $0x1e0] sm:$0xff] %v808_v28  ;;  %v971_v47 = vadd.f32 %v970_v35, %v1973_v56 }
 0x155   : > { %1083 = vst [vmem:[%s1913_s29 + $0x1f0] sm:$0xff] %v969_v32  ;;  %1082 = vst [vmem:[%s1913_s29 + $0x1e8] sm:$0xff] %v810_v34  ;;  %v813_v36 = vpop.f32.mrb[48].mxu0 }
 0x156   : > { %1084 = vst [vmem:[%s1913_s29 + $0x1f8] sm:$0xff] %v971_v47  ;;  %v814_v37 = vadd.f32 %v813_v36, %v1983_v3  ;;  %v974_v39 = vpop.f32.mrb[48].mxu1  ;;  %v815_v40 = vpop.f32.mrb[49].mxu0 }
 0x157   : > { %v975_v41 = vadd.f32 %v974_v39, %v1983_v3  ;;  %v816_v42 = vadd.f32 %v815_v40, %v1983_v3  ;;  %v976_v58 = vpop.f32.mrb[49].mxu1 }
 0x158   : > { %1089 = vst [vmem:[%s1913_s29 + $0x220] sm:$0xff] %v814_v37  ;;  %v977_v56 = vadd.f32 %v976_v58, %v1983_v3 }
 0x159   : > { %1091 = vst [vmem:[%s1913_s29 + $0x230] sm:$0xff] %v975_v41  ;;  %1090 = vst [vmem:[%s1913_s29 + $0x228] sm:$0xff] %v816_v42  ;;  %v819_v44 = vpop.f32.mrb[50].mxu0 }
 0x15a   : > { %1092 = vst [vmem:[%s1913_s29 + $0x238] sm:$0xff] %v977_v56  ;;  %v820_v45 = vadd.f32 %v819_v44, %v1993_v13  ;;  %v980_v46 = vpop.f32.mrb[50].mxu1  ;;  %v821_v48 = vpop.f32.mrb[51].mxu0 }
 0x15b   : > { %v981_v49 = vadd.f32 %v980_v46, %v1993_v13  ;;  %v822_v50 = vadd.f32 %v821_v48, %v1993_v13  ;;  %v982_v51 = vpop.f32.mrb[51].mxu1 }
 0x15c   : > { %1097 = vst [vmem:[%s1913_s29 + $0x260] sm:$0xff] %v820_v45  ;;  %v983_v3 = vadd.f32 %v982_v51, %v1993_v13 }
 0x15d   : > { %1099 = vst [vmem:[%s1913_s29 + $0x270] sm:$0xff] %v981_v49  ;;  %1098 = vst [vmem:[%s1913_s29 + $0x268] sm:$0xff] %v822_v50  ;;  %v825_v2 = vpop.f32.mrb[52].mxu0 }
 0x15e   : > { %1100 = vst [vmem:[%s1913_s29 + $0x278] sm:$0xff] %v983_v3  ;;  %v826_v52 = vadd.f32 %v825_v2, %v2003_v23  ;;  %v986_v54 = vpop.f32.mrb[52].mxu1  ;;  %v827_v55 = vpop.f32.mrb[53].mxu0 }
 0x15f   : > { %v987_v57 = vadd.f32 %v986_v54, %v2003_v23  ;;  %v828_v59 = vadd.f32 %v827_v55, %v2003_v23  ;;  %v988_v60 = vpop.f32.mrb[53].mxu1 }
 0x160   : > { %1105 = vst [vmem:[%s1913_s29 + $0x2a0] sm:$0xff] %v826_v52  ;;  %v989_v13 = vadd.f32 %v988_v60, %v2003_v23 }
 0x161   : > { %1107 = vst [vmem:[%s1913_s29 + $0x2b0] sm:$0xff] %v987_v57  ;;  %1106 = vst [vmem:[%s1913_s29 + $0x2a8] sm:$0xff] %v828_v59  ;;  %v831_v61 = vpop.f32.mrb[54].mxu0 }
 0x162   : > { %1108 = vst [vmem:[%s1913_s29 + $0x2b8] sm:$0xff] %v989_v13  ;;  %v832_v5 = vadd.f32 %v831_v61, %v2013_v33  ;;  %v992_v62 = vpop.f32.mrb[54].mxu1  ;;  %v833_v63 = vpop.f32.mrb[55].mxu0 }
 0x163   : > { %v993_v1 = vadd.f32 %v992_v62, %v2013_v33  ;;  %v834_v4 = vadd.f32 %v833_v63, %v2013_v33  ;;  %v994_v6 = vpop.f32.mrb[55].mxu1 }
 0x164   : > { %1113 = vst [vmem:[%s1913_s29 + $0x2e0] sm:$0xff] %v832_v5  ;;  %v995_v23 = vadd.f32 %v994_v6, %v2013_v33 }
 0x165   : > { %1115 = vst [vmem:[%s1913_s29 + $0x2f0] sm:$0xff] %v993_v1  ;;  %1114 = vst [vmem:[%s1913_s29 + $0x2e8] sm:$0xff] %v834_v4  ;;  %v837_v7 = vpop.f32.mrb[56].mxu0 }
 0x166   : > { %1116 = vst [vmem:[%s1913_s29 + $0x2f8] sm:$0xff] %v995_v23  ;;  %v838_v8 = vadd.f32 %v837_v7, %v2023_v43  ;;  %v998_v20 = vpop.f32.mrb[56].mxu1  ;;  %v839_v9 = vpop.f32.mrb[57].mxu0 }
 0x167   : > { %v999_v10 = vadd.f32 %v998_v20, %v2023_v43  ;;  %v840_v11 = vadd.f32 %v839_v9, %v2023_v43  ;;  %v1000_v14 = vpop.f32.mrb[57].mxu1 }
 0x168   : > { %1121 = vst [vmem:[%s1913_s29 + $0x320] sm:$0xff] %v838_v8  ;;  %v1001_v33 = vadd.f32 %v1000_v14, %v2023_v43 }
 0x169   : > { %1123 = vst [vmem:[%s1913_s29 + $0x330] sm:$0xff] %v999_v10  ;;  %1122 = vst [vmem:[%s1913_s29 + $0x328] sm:$0xff] %v840_v11  ;;  %v843_v15 = vpop.f32.mrb[58].mxu0 }
 0x16a   : > { %1124 = vst [vmem:[%s1913_s29 + $0x338] sm:$0xff] %v1001_v33  ;;  %v844_v16 = vadd.f32 %v843_v15, %v2033_v53  ;;  %v1004_v17 = vpop.f32.mrb[58].mxu1  ;;  %v845_v29 = vpop.f32.mrb[59].mxu0 }
 0x16b   : > { %v1005_v18 = vadd.f32 %v1004_v17, %v2033_v53  ;;  %v846_v19 = vadd.f32 %v845_v29, %v2033_v53  ;;  %v1006_v21 = vpop.f32.mrb[59].mxu1 }
 0x16c   : > { %1129 = vst [vmem:[%s1913_s29 + $0x360] sm:$0xff] %v844_v16  ;;  %v1007_v43 = vadd.f32 %v1006_v21, %v2033_v53 }
 0x16d   : > { %1131 = vst [vmem:[%s1913_s29 + $0x370] sm:$0xff] %v1005_v18  ;;  %1130 = vst [vmem:[%s1913_s29 + $0x368] sm:$0xff] %v846_v19  ;;  %v849_v22 = vpop.f32.mrb[60].mxu0 }
 0x16e   : > { %1132 = vst [vmem:[%s1913_s29 + $0x378] sm:$0xff] %v1007_v43  ;;  %v850_v24 = vadd.f32 %v849_v22, %v2043_v0  ;;  %v1010_v25 = vpop.f32.mrb[60].mxu1  ;;  %v851_v26 = vpop.f32.mrb[61].mxu0 }
 0x16f   : > { %v1011_v38 = vadd.f32 %v1010_v25, %v2043_v0  ;;  %v852_v27 = vadd.f32 %v851_v26, %v2043_v0  ;;  %v1012_v28 = vpop.f32.mrb[61].mxu1 }
 0x170   : > { %1137 = vst [vmem:[%s1913_s29 + $0x3a0] sm:$0xff] %v850_v24  ;;  %v1013_v30 = vadd.f32 %v1012_v28, %v2043_v0 }
 0x171   : > { %1139 = vst [vmem:[%s1913_s29 + $0x3b0] sm:$0xff] %v1011_v38  ;;  %1138 = vst [vmem:[%s1913_s29 + $0x3a8] sm:$0xff] %v852_v27  ;;  %v855_v53 = vpop.f32.mrb[62].mxu0 }
 0x172   : > { %1140 = vst [vmem:[%s1913_s29 + $0x3b8] sm:$0xff] %v1013_v30  ;;  %v856_v31 = vadd.f32 %v855_v53, %v2053_v12  ;;  %v1016_v32 = vpop.f32.mrb[62].mxu1  ;;  %v857_v34 = vpop.f32.mrb[63].mxu0 }
 0x173   : > { %v1017_v35 = vadd.f32 %v1016_v32, %v2053_v12  ;;  %v858_v47 = vadd.f32 %v857_v34, %v2053_v12  ;;  %v1018_v0 = vpop.f32.mrb[63].mxu1 }
 0x174   : > { %1145 = vst [vmem:[%s1913_s29 + $0x3e0] sm:$0xff] %v856_v31  ;;  %v1019_v36 = vadd.f32 %v1018_v0, %v2053_v12 }
 0x175   : > { %1147 = vst [vmem:[%s1913_s29 + $0x3f0] sm:$0xff] %v1017_v35  ;;  %1146 = vst [vmem:[%s1913_s29 + $0x3e8] sm:$0xff] %v858_v47 }
 0x176   : > { %1148 = vst [vmem:[%s1913_s29 + $0x3f8] sm:$0xff] %v1019_v36 }
 0x177   : > { %1413 = shalt.err (!%p1410_p5)
}
 0x178   : > { %s1414_s18 = scalar_lea.hbm %s2196_s6, 16384  ;;  %s1418_s23 = scalar_lea.hbm %s2256_s3, 32768 }
 0x179   : > { %p1415_p6 = scmp.ne.s32.totalorder %s2196_s6, %s1414_s18  ;;  %p1419_p10 = scmp.lt.u32.totalorder %s2196_s6, %s2256_s3 }
 0x17a   : > { %p1420_p11 = scmp.lt.u32.totalorder %s1418_s23, %s1414_s18  ;;  %p1422_p13 = scmp.lt.u32.totalorder %s1414_s18, %s2196_s6 }
 0x17b   : > { %p1416_p7 = pnand %p1415_p6, %p1545_p4 }
 0x17c   : > { %p1421_p12 = por %p1420_p11, %p1419_p10 }
 0x17d   : > { %p1417_p9 = pneg %p1416_p7 }
 0x17e   : > { %p1423_p0 = por %p1422_p13, %p1421_p12 }
 0x180   : > { %p1424_p1 = pnand %p1423_p0, %p1417_p9 }
 0x182   : > { %1427 = shalt.err (!%p1424_p1)
}
 0x183   : > { %s1483_s28 = smov 1024   ;;  %s1484_s29 = smov 64  }
 0x184   : > { %1339 = dma.vmem_to_hbm [thread:$0]  (%p1545_p4), %s2198_s4, 16384, %s2196_s6, %s2207_s7, %s1483_s28, %s1483_s28, %s1484_s29  }
 0x185 PF: > { %p1345_p2 = scmp.ge.s32.totalorder %s1478_s17, 2  ;;  %s1180_s30 = sand.u32 1, %s1458_s12  }
 0x186   : > { %s1181_s15 = scalar_lea.sflag [#allocation3], %s1180_s30 }
 0x187   : > { %p1342_p3 = pnand %p1345_p2, %p1552_p8 }
 0x189   : > { %1453 = dma.done.wait (!%p1342_p3), %s1181_s15, 16384  }
 0x18a   : > { %1455 = vsyncadd (!%p1342_p3), %s1181_s15, 4294950912  ;;  %s16_s17 = sadd.s32 1, %s1478_s17   ;;  %s2259_s12 = smov %s1462_s13 }
 0x18b   : > { %p13_p5 = scmp.ge.s32.totalorder %s16_s17, 4   ;;  %s2260_s13 = smov %s1466_s14 }
 0x18c   : > { %s2261_s14 = smov %s1558_s25  ;;  %s2262_s15 = smov %s1474_s16 }
 0x18d   : > { %s2263_s16 = smov %s2265_s20  ;;  %15 = sbr.rel (!%p13_p5) target bundleno = 4 (0x4), region = 67 }
 0x194   :  { %1186 = vsyncpa [#allocation3], 1 }
 0x195   :  { %1188 = vsyncpa [#allocation3 + $0x1], 1 }

</bundles_post_ra>
